<compile_context>
chip_gen: v7x
topology: tpu7x:2x2x1
jax: 0.10.0
libtpu: 0.0.40
codegen_flags: <defaults>
</compile_context>

<pallas_src>
import functools

import jax
import jax.numpy as jnp
from jax.experimental import pallas as pl
from jax.experimental.pallas import tpu as pltpu

NEG_SLOPE = 0.01   # F.leaky_relu default
BN_EPS = 1e-5      # nn.BatchNorm1d default
LANE = 128
HID = 128          # padded width of the narrow hidden layers (64, 32 -> 128)


def _leaky_relu(v):
    # max(v, 0.01*v): 2 VALU ops instead of cmp+mul+select.
    return jnp.maximum(v, NEG_SLOPE * v)


def _round_up(n, m):
    return ((n + m - 1) // m) * m


def dqn_kernel(x_ref, w1_ref, wmid_ref, w5_ref, b_ref, o_ref):
    # Dropout(0.2) is identity in eval mode.
    # TODO(synk): training-mode dropout (stochastic mask via pltpu.prng_*) not emitted.
    cdt = w1_ref.dtype  # bf16 compute dtype for layers 1-4

    h = x_ref[...].astype(cdt)

    # Layer 1: state_size -> 256
    z = jnp.dot(h, w1_ref[...], preferred_element_type=jnp.float32) + b_ref[0:1, 0:256]
    h = _leaky_relu(z).astype(cdt)

    # Layer 2: 256 -> 128
    z = jnp.dot(h, wmid_ref[0:256, :], preferred_element_type=jnp.float32) + b_ref[0:1, 256:384]
    h = _leaky_relu(z).astype(cdt)

    # Layer 3: 128 -> 128 (real width 64, zero-padded)
    z = jnp.dot(h, wmid_ref[256:384, :], preferred_element_type=jnp.float32) + b_ref[0:1, 384:512]
    h = _leaky_relu(z).astype(cdt)

    # Layer 4: 128 -> 128 (real width 32, zero-padded)
    z = jnp.dot(h, wmid_ref[384:512, :], preferred_element_type=jnp.float32) + b_ref[0:1, 512:640]
    h = _leaky_relu(z)  # keep f32 into the head for Q-value fidelity

    # Head: 128 -> 128 (real width action_size, zero-padded), f32, no activation.
    out = jnp.dot(h, w5_ref[...], preferred_element_type=jnp.float32) + b_ref[0:1, 640:768]
    o_ref[...] = out.astype(o_ref.dtype)


def _full_spec(shape):
    # Whole array resident in VMEM; constant index_map -> DMA'd once.
    return pl.BlockSpec(shape, lambda i: (0,) * len(shape))


def init_dqn_params(key, state_size, action_size):
    """Raw PyTorch-style parameters (Linear weights (out,in), BN stats)."""
    dims = [state_size, 256, 128, 64, 32, action_size]
    raw = {}
    keys = jax.random.split(key, 5 * 2 + 4 * 4)
    ki = 0
    for layer in range(5):
        fan_in, fan_out = dims[layer], dims[layer + 1]
        bound = 1.0 / (fan_in ** 0.5)
        raw[f"fc{layer+1}.weight"] = jax.random.uniform(
            keys[ki], (fan_out, fan_in), jnp.float32, -bound, bound); ki += 1
        raw[f"fc{layer+1}.bias"] = jax.random.uniform(
            keys[ki], (fan_out,), jnp.float32, -bound, bound); ki += 1
    for layer in range(4):  # bn1..bn4
        n = dims[layer + 1]
        raw[f"bn{layer+1}.weight"] = 1.0 + 0.1 * jax.random.normal(keys[ki], (n,), jnp.float32); ki += 1
        raw[f"bn{layer+1}.bias"] = 0.1 * jax.random.normal(keys[ki], (n,), jnp.float32); ki += 1
        raw[f"bn{layer+1}.running_mean"] = 0.05 * jax.random.normal(keys[ki], (n,), jnp.float32); ki += 1
        raw[f"bn{layer+1}.running_var"] = jnp.abs(
            1.0 + 0.1 * jax.random.normal(keys[ki], (n,), jnp.float32)); ki += 1
    return raw


def fold_params(raw, action_size, compute_dtype=jnp.bfloat16):
    """Fold eval-mode BN + Linear bias into (W', c'); pad narrow dims to 128;
    pack weights/biases into few slabs to cut startup DMA count."""

    def folded_wc(layer):
        w = raw[f"fc{layer}.weight"]                      # (out, in)
        b = raw[f"fc{layer}.bias"]                        # (out,)
        gamma = raw[f"bn{layer}.weight"]
        beta = raw[f"bn{layer}.bias"]
        mean = raw[f"bn{layer}.running_mean"]
        var = raw[f"bn{layer}.running_var"]
        scale = gamma / jnp.sqrt(var + BN_EPS)            # (out,)
        shift = beta - mean * scale
        return (w * scale[:, None]).T, b * scale + shift  # (in,out) f32, (out,) f32

    def pad2(a, rows, cols):
        return jnp.zeros((rows, cols), a.dtype).at[:a.shape[0], :a.shape[1]].set(a)

    def pad1(a, n):
        return jnp.zeros((n,), a.dtype).at[:a.shape[0]].set(a)

    w1, c1 = folded_wc(1)        # (state, 256), (256,)
    w2, c2 = folded_wc(2)        # (256, 128),   (128,)
    w3, c3 = folded_wc(3)        # (128, 64),    (64,)
    w4, c4 = folded_wc(4)        # (64, 32),     (32,)
    w5 = raw["fc5.weight"].T     # (32, action_size)
    c5 = raw["fc5.bias"]

    # Zero-pad the narrow dims up to 128 (zeros are preserved by leaky_relu and
    # contribute nothing through zero-padded input rows of the next weight).
    w3p = pad2(w3, 128, HID)
    w4p = pad2(w4, HID, HID)
    w5p = pad2(w5, HID, LANE)
    c3p = pad1(c3, HID)
    c4p = pad1(c4, HID)
    c5p = pad1(c5, LANE)

    return {
        # bf16 MXU inputs (layers 1-4)
        "w1": w1.astype(compute_dtype),                                        # (state, 256)
        "wmid": jnp.concatenate([w2, w3p, w4p], axis=0).astype(compute_dtype), # (512, 128)
        # f32 head for Q-value fidelity
        "w5": w5p.astype(jnp.float32),                                         # (128, 128)
        # all biases in one lane-aligned f32 slab: [c1 |c2 |c3 |c4 |c5]
        "bias": jnp.concatenate([c1, c2, c3p, c4p, c5p])[None, :],             # (1, 768)
    }


@functools.partial(jax.jit, static_argnames=("action_size", "batch_tile"))
def dqn_forward(x, params, action_size, batch_tile=512):
    """x: (B, state_size) float32. params: folded params from fold_params()."""
    B, state_size = x.shape
    n_pad = params["w5"].shape[1]  # 128

    # One tile unless B exceeds batch_tile (grid is a serial loop on 1-TC
    # chips); tile rounded to a multiple of 16 for bf16 sublane packing.
    bt = min(batch_tile, _round_up(B, 16))
    bt = max(16, (bt // 16) * 16)
    B_pad = _round_up(B, bt)

    xp = x if B_pad == B else jnp.pad(x, ((0, B_pad - B), (0, 0)))

    args = (params["w1"], params["wmid"], params["w5"], params["bias"])

    in_specs = [pl.BlockSpec((bt, state_size), lambda i: (i, 0))]
    in_specs += [_full_spec(a.shape) for a in args]
    out_specs = pl.BlockSpec((bt, n_pad), lambda i: (i, 0))

    dims = [state_size, 256, 128, HID, HID, n_pad]
    flops = 2 * B_pad * sum(dims[l] * dims[l + 1] for l in range(5))
    bytes_accessed = (xp.size * xp.dtype.itemsize
                      + sum(a.size * a.dtype.itemsize for a in args)
                      + B_pad * n_pad * 2)

    out = pl.pallas_call(
        dqn_kernel,
        out_shape=jax.ShapeDtypeStruct((B_pad, n_pad), jnp.bfloat16),
        grid_spec=pltpu.PrefetchScalarGridSpec(
            num_scalar_prefetch=0,
            grid=(B_pad // bt,),
            in_specs=in_specs,
            out_specs=out_specs,
        ),
        compiler_params=pltpu.CompilerParams(
            dimension_semantics=("parallel",),
        ),
        cost_estimate=pl.CostEstimate(
            flops=flops, transcendentals=0, bytes_accessed=bytes_accessed),
    )(xp, *args)

    return out[:B, :action_size].astype(jnp.float32)


def dqn_reference(x, raw):
    """Pure-JAX f32 reference of the eval-mode PyTorch forward pass."""
    h = x
    for layer in range(1, 5):
        h = h @ raw[f"fc{layer}.weight"].T + raw[f"fc{layer}.bias"]
        h = ((h - raw[f"bn{layer}.running_mean"])
             / jnp.sqrt(raw[f"bn{layer}.running_var"] + BN_EPS)
             * raw[f"bn{layer}.weight"] + raw[f"bn{layer}.bias"])
        h = jnp.where(h > 0, h, NEG_SLOPE * h)
    return h @ raw["fc5.weight"].T + raw["fc5.bias"]


if __name__ == "__main__":
    state_size = 32
    action_size = 4
    batch = 64

    key = jax.random.PRNGKey(0)
    k_x, k_p = jax.random.split(key)
    x = jax.random.normal(k_x, (batch, state_size), jnp.float32)
    raw = init_dqn_params(k_p, state_size, action_size)
    params = fold_params(raw, action_size, compute_dtype=jnp.bfloat16)

    out = dqn_forward(x, params, action_size=action_size)
    out = jax.block_until_ready(out)

    ref = dqn_reference(x, raw)
    assert out.shape == (batch, action_size)
    max_err = jnp.max(jnp.abs(out - ref))
    assert jnp.allclose(out, ref, atol=5e-2, rtol=5e-2), f"max abs err = {max_err}"
    print("KERNEL_OK")
</pallas_src>

<mosaic_0001>
module attributes {stable_mosaic.version = 11 : i64} {
  func.func @dqn_kernel(%arg0: i32, %arg1: memref<64x32xf32, #tpu.memory_space<vmem>>, %arg2: memref<32x256xbf16, #tpu.memory_space<vmem>>, %arg3: memref<512x128xbf16, #tpu.memory_space<vmem>>, %arg4: memref<128x128xf32, #tpu.memory_space<vmem>>, %arg5: memref<1x768xf32, #tpu.memory_space<vmem>>, %arg6: memref<64x128xbf16, #tpu.memory_space<vmem>>) attributes {dimension_semantics = [#tpu.dimension_semantics<parallel>], iteration_bounds = array<i64: 1>, scalar_prefetch = 0 : i64, scratch_operands = 0 : i64, tpu.core_type = #tpu.core_type<tc>, window_params = [{transform_indices = @transform_0, window_bounds = array<i64: 64, 32>}, {pipeline_mode = #tpu.pipeline_mode<synchronous>, transform_indices = @transform_1, window_bounds = array<i64: 32, 256>}, {pipeline_mode = #tpu.pipeline_mode<synchronous>, transform_indices = @transform_2, window_bounds = array<i64: 512, 128>}, {pipeline_mode = #tpu.pipeline_mode<synchronous>, transform_indices = @transform_3, window_bounds = array<i64: 128, 128>}, {pipeline_mode = #tpu.pipeline_mode<synchronous>, transform_indices = @transform_4, window_bounds = array<i64: 1, 768>}, {transform_indices = @transform_5, window_bounds = array<i64: 64, 128>}]} {
    %c0 = arith.constant 0 : index
    %c0_0 = arith.constant 0 : index
    %0 = vector.load %arg1[%c0, %c0_0] : memref<64x32xf32, #tpu.memory_space<vmem>>, vector<64x32xf32>
    %1 = arith.truncf %0 : vector<64x32xf32> to vector<64x32xbf16>
    %c0_1 = arith.constant 0 : index
    %c0_2 = arith.constant 0 : index
    %2 = vector.load %arg2[%c0_1, %c0_2] : memref<32x256xbf16, #tpu.memory_space<vmem>>, vector<32x256xbf16>
    %cst = arith.constant dense<0.000000e+00> : vector<64x256xf32>
    %3 = tpu.matmul %1, %2, %cst {dimension_numbers = #tpu.dot_dimension_numbers<[1], [0], [0], [1], [0, 0, 1, 1], [], []>} : vector<64x32xbf16>, vector<32x256xbf16>, vector<64x256xf32> -> vector<64x256xf32>
    %c0_3 = arith.constant 0 : index
    %c0_4 = arith.constant 0 : index
    %4 = vector.load %arg5[%c0_3, %c0_4] : memref<1x768xf32, #tpu.memory_space<vmem>>, vector<1x256xf32>
    %5 = vector.broadcast %4 : vector<1x256xf32> to vector<64x256xf32>
    %6 = arith.addf %3, %5 : vector<64x256xf32>
    %cst_5 = arith.constant 0.00999999977 : f32
    %7 = vector.broadcast %cst_5 : f32 to vector<64x256xf32>
    %8 = arith.mulf %7, %6 : vector<64x256xf32>
    %9 = arith.maximumf %6, %8 : vector<64x256xf32>
    %10 = arith.truncf %9 : vector<64x256xf32> to vector<64x256xbf16>
    %c0_6 = arith.constant 0 : index
    %c0_7 = arith.constant 0 : index
    %11 = vector.load %arg3[%c0_6, %c0_7] : memref<512x128xbf16, #tpu.memory_space<vmem>>, vector<256x128xbf16>
    %cst_8 = arith.constant dense<0.000000e+00> : vector<64x128xf32>
    %12 = tpu.matmul %10, %11, %cst_8 {dimension_numbers = #tpu.dot_dimension_numbers<[1], [0], [0], [1], [0, 0, 1, 1], [], []>} : vector<64x256xbf16>, vector<256x128xbf16>, vector<64x128xf32> -> vector<64x128xf32>
    %c0_9 = arith.constant 0 : index
    %c256 = arith.constant 256 : index
    %13 = vector.load %arg5[%c0_9, %c256] : memref<1x768xf32, #tpu.memory_space<vmem>>, vector<1x128xf32>
    %14 = vector.broadcast %13 : vector<1x128xf32> to vector<64x128xf32>
    %15 = arith.addf %12, %14 : vector<64x128xf32>
    %cst_10 = arith.constant 0.00999999977 : f32
    %16 = vector.broadcast %cst_10 : f32 to vector<64x128xf32>
    %17 = arith.mulf %16, %15 : vector<64x128xf32>
    %18 = arith.maximumf %15, %17 : vector<64x128xf32>
    %19 = arith.truncf %18 : vector<64x128xf32> to vector<64x128xbf16>
    %c256_11 = arith.constant 256 : index
    %c0_12 = arith.constant 0 : index
    %20 = vector.load %arg3[%c256_11, %c0_12] : memref<512x128xbf16, #tpu.memory_space<vmem>>, vector<128x128xbf16>
    %cst_13 = arith.constant dense<0.000000e+00> : vector<64x128xf32>
    %21 = tpu.matmul %19, %20, %cst_13 {dimension_numbers = #tpu.dot_dimension_numbers<[1], [0], [0], [1], [0, 0, 1, 1], [], []>} : vector<64x128xbf16>, vector<128x128xbf16>, vector<64x128xf32> -> vector<64x128xf32>
    %c0_14 = arith.constant 0 : index
    %c384 = arith.constant 384 : index
    %22 = vector.load %arg5[%c0_14, %c384] : memref<1x768xf32, #tpu.memory_space<vmem>>, vector<1x128xf32>
    %23 = vector.broadcast %22 : vector<1x128xf32> to vector<64x128xf32>
    %24 = arith.addf %21, %23 : vector<64x128xf32>
    %cst_15 = arith.constant 0.00999999977 : f32
    %25 = vector.broadcast %cst_15 : f32 to vector<64x128xf32>
    %26 = arith.mulf %25, %24 : vector<64x128xf32>
    %27 = arith.maximumf %24, %26 : vector<64x128xf32>
    %28 = arith.truncf %27 : vector<64x128xf32> to vector<64x128xbf16>
    %c384_16 = arith.constant 384 : index
    %c0_17 = arith.constant 0 : index
    %29 = vector.load %arg3[%c384_16, %c0_17] : memref<512x128xbf16, #tpu.memory_space<vmem>>, vector<128x128xbf16>
    %cst_18 = arith.constant dense<0.000000e+00> : vector<64x128xf32>
    %30 = tpu.matmul %28, %29, %cst_18 {dimension_numbers = #tpu.dot_dimension_numbers<[1], [0], [0], [1], [0, 0, 1, 1], [], []>} : vector<64x128xbf16>, vector<128x128xbf16>, vector<64x128xf32> -> vector<64x128xf32>
    %c0_19 = arith.constant 0 : index
    %c512 = arith.constant 512 : index
    %31 = vector.load %arg5[%c0_19, %c512] : memref<1x768xf32, #tpu.memory_space<vmem>>, vector<1x128xf32>
    %32 = vector.broadcast %31 : vector<1x128xf32> to vector<64x128xf32>
    %33 = arith.addf %30, %32 : vector<64x128xf32>
    %cst_20 = arith.constant 0.00999999977 : f32
    %34 = vector.broadcast %cst_20 : f32 to vector<64x128xf32>
    %35 = arith.mulf %34, %33 : vector<64x128xf32>
    %36 = arith.maximumf %33, %35 : vector<64x128xf32>
    %c0_21 = arith.constant 0 : index
    %c0_22 = arith.constant 0 : index
    %37 = vector.load %arg4[%c0_21, %c0_22] : memref<128x128xf32, #tpu.memory_space<vmem>>, vector<128x128xf32>
    %cst_23 = arith.constant dense<0.000000e+00> : vector<64x128xf32>
    %38 = tpu.matmul %36, %37, %cst_23 {dimension_numbers = #tpu.dot_dimension_numbers<[1], [0], [0], [1], [0, 0, 1, 1], [], []>} : vector<64x128xf32>, vector<128x128xf32>, vector<64x128xf32> -> vector<64x128xf32>
    %c0_24 = arith.constant 0 : index
    %c640 = arith.constant 640 : index
    %39 = vector.load %arg5[%c0_24, %c640] : memref<1x768xf32, #tpu.memory_space<vmem>>, vector<1x128xf32>
    %40 = vector.broadcast %39 : vector<1x128xf32> to vector<64x128xf32>
    %41 = arith.addf %38, %40 : vector<64x128xf32>
    %42 = arith.truncf %41 : vector<64x128xf32> to vector<64x128xbf16>
    %c0_25 = arith.constant 0 : index
    %c0_26 = arith.constant 0 : index
    %43 = vector.load %arg6[%c0_25, %c0_26] : memref<64x128xbf16, #tpu.memory_space<vmem>>, vector<64x128xbf16>
    tpu.vector_store %arg6[%c0_25, %c0_26], %42 {strides = array<i32>} : memref<64x128xbf16, #tpu.memory_space<vmem>>, vector<64x128xbf16>,
    return
  }
  func.func @transform_0(%arg0: i32) -> (i32, i32) {
    %c0_i32 = arith.constant 0 : i32
    %c0_i32_0 = arith.constant 0 : i32
    return %arg0, %c0_i32 : i32, i32
  }
  func.func @transform_1(%arg0: i32) -> (i32, i32) {
    %c0_i32 = arith.constant 0 : i32
    %c0_i32_0 = arith.constant 0 : i32
    %c0_i32_1 = arith.constant 0 : i32
    return %c0_i32, %c0_i32_0 : i32, i32
  }
  func.func @transform_2(%arg0: i32) -> (i32, i32) {
    %c0_i32 = arith.constant 0 : i32
    %c0_i32_0 = arith.constant 0 : i32
    %c0_i32_1 = arith.constant 0 : i32
    return %c0_i32, %c0_i32_0 : i32, i32
  }
  func.func @transform_3(%arg0: i32) -> (i32, i32) {
    %c0_i32 = arith.constant 0 : i32
    %c0_i32_0 = arith.constant 0 : i32
    %c0_i32_1 = arith.constant 0 : i32
    return %c0_i32, %c0_i32_0 : i32, i32
  }
  func.func @transform_4(%arg0: i32) -> (i32, i32) {
    %c0_i32 = arith.constant 0 : i32
    %c0_i32_0 = arith.constant 0 : i32
    %c0_i32_1 = arith.constant 0 : i32
    return %c0_i32, %c0_i32_0 : i32, i32
  }
  func.func @transform_5(%arg0: i32) -> (i32, i32) {
    %c0_i32 = arith.constant 0 : i32
    %c0_i32_0 = arith.constant 0 : i32
    return %arg0, %c0_i32 : i32, i32
  }
}

</mosaic_0001>

<bundles_post_ra>
// kernel: dqn_forward.1
= control target key start
LH: loop header
LB: loop body
LE: loop exit
PB: predicated region body
PF: predicated region fallthrough
CT: control target
= control target key end

     0   :  { %10 = vsyncpa [#allocation3], 0  ;;  %s1461_s0 = inlined_call_operand.vmem [shape: f32[64,32], index: 0, kind: input, shape index: {}]   ;;  %s1462_s1 = inlined_call_operand.vmem [shape: bf16[32,256], index: 1, kind: input, shape index: {}]   ;;  %s1463_s2 = inlined_call_operand.hbm [shape: bf16[512,128], index: 2, kind: input, shape index: {}]   ;;  %s1464_s3 = inlined_call_operand.hbm [shape: f32[128,128], index: 3, kind: input, shape index: {}]   ;;  %s1465_s4 = inlined_call_operand.vmem [shape: f32[1,768], index: 4, kind: input, shape index: {}]   ;;  %s1466_s5 = inlined_call_operand.vmem [shape: bf16[64,128], index: 5, kind: output, shape index: {}]  }
   0x1   :  { %11 = vsyncpa [#allocation5], 0  ;;  %s1313_s18 = smov [#allocation2]   ;;  %s1265_s22 = scalar_lea.hbm %s1463_s2, 4096 }
   0x2   :  { %s21_s19 = sshll.u32 %s1313_s18, 4  ;;  %p1266_p0 = scmp.ne.s32.totalorder %s1463_s2, %s1265_s22  ;;  %s22_s19 = int_to_ptr.vmem [resolvable:$true] %s21_s19 }
   0x3   :  { %p1269_p1 = scmp.lt.u32.totalorder %s1265_s22, %s1463_s2 }
   0x5   :  { %p1271_p2 = pnand %p1269_p1, %p1266_p0 }
   0x7   :  { %1274 = shalt.err (!%p1271_p2)
}
   0x8   :  { %s1275_s27 = scalar_lea.vmem %s22_s19, 4096  ;;  %p1280_p4 = scmp.lt.s32.totalorder %s22_s19, %s22_s19 }
   0x9   :  { %p1276_p3 = scmp.ne.s32.totalorder %s22_s19, %s1275_s27  ;;  %p1281_p5 = scmp.lt.s32.totalorder %s1275_s27, %s1275_s27 }
   0xb   :  { %p1282_p6 = por %p1281_p5, %p1280_p4 }
   0xd   :  { %p1283_p7 = pnand %p1282_p6, %p1276_p3 }
   0xf   :  { %1286 = shalt.err (!%p1283_p7)
}
  0x10   :  { %s1314_s28 = smov 64   ;;  %s1315_s29 = smov 4  }
  0x11   :  { %27 = dma.hbm_to_vmem [thread:$0]  %s1463_s2, 4096, %s22_s19, [#allocation3], %s1314_s28, %s1314_s28, %s1315_s29  }
  0x12   :  { %s1316_s7 = smov [#allocation4]   ;;  %s1287_s11 = scalar_lea.hbm %s1464_s3, 2048 }
  0x13   :  { %s33_s8 = sshll.u32 %s1316_s7, 4  ;;  %p1288_p8 = scmp.ne.s32.totalorder %s1464_s3, %s1287_s11  ;;  %s34_s8 = int_to_ptr.vmem [resolvable:$true] %s33_s8 }
  0x14   :  { %p1291_p9 = scmp.lt.u32.totalorder %s1287_s11, %s1464_s3 }
  0x16   :  { %p1293_p10 = pnand %p1291_p9, %p1288_p8 }
  0x18   :  { %1296 = shalt.err (!%p1293_p10)
}
  0x19   :  { %s1297_s16 = scalar_lea.vmem %s34_s8, 2048  ;;  %p1302_p12 = scmp.lt.s32.totalorder %s34_s8, %s34_s8 }
  0x1a   :  { %p1298_p11 = scmp.ne.s32.totalorder %s34_s8, %s1297_s16  ;;  %p1303_p13 = scmp.lt.s32.totalorder %s1297_s16, %s1297_s16 }
  0x1c   :  { %p1304_p0 = por %p1303_p13, %p1302_p12 }
  0x1e   :  { %p1305_p1 = pnand %p1304_p0, %p1298_p11 }
  0x20   :  { %1308 = shalt.err (!%p1305_p1)
}
  0x21   :  { %s1317_s2 = smov 128   ;;  %s1318_s17 = smov 8  }
  0x22   :  { %39 = dma.hbm_to_vmem [thread:$0]  %s1464_s3, 2048, %s34_s8, [#allocation5], %s1317_s2, %s1317_s2, %s1318_s17  }
  0x23   :  { %1309 = dma.done.wait [#allocation3], 4096  }
  0x24   :  { %1310 = vsyncadd [#allocation3], 4294963200 }
  0x25   :  { %1311 = dma.done.wait [#allocation5], 2048  }
  0x26   :  { %1312 = vsyncadd [#allocation5], 4294965248  ;;  %v1319_v0 = vmov 0   ;;  %v1227_v1 = vld [vmem:[%s1462_s1 + $0x4] ss:$8 sps:$4 sm:$0xff]   ;;  %vm97_vm0 = vcmask 261120   ;;  %v67_v36 = vlaneseq }
  0x27   :  { %142 = vmatprep.mubr.bf16.mxu0 %v1319_v0  ;;  %v1229_v2 = vld [vmem:[%s1462_s1] ss:$8 sps:$4 sm:$0xff]   ;;  %110 = vmatprep.subr.bf16.mxu0 %v1227_v1  ;;  %v1230_v3 = vld [vmem:[%s1462_s1 + $0x14] ss:$8 sps:$4 sm:$0xff]   ;;  %v1232_v4 = vld [vmem:[%s1462_s1 + $0x10] ss:$8 sps:$4 sm:$0xff]  }
  0x28   :  { %111 = vmatpush1.bf16.msra.mxu0 %v1229_v2  ;;  %v49_v5 = vld [vmem:[%s1461_s0] sm:$0xff]  ;;  %v50_v6 = vld [vmem:[%s1461_s0 + $0x8] sm:$0xff]  ;;  %v51_v11 = vld [vmem:[%s1461_s0 + $0x10] sm:$0xff]  ;;  %v68_v37 = vshrl.u32 %v67_v36, 7 }
  0x29   :  { %112 = vmatprep.subr.bf16.mxu0 %v1230_v3  ;;  %v57_v7 = vpack.c.bf16 %v50_v6, %v49_v5  ;;  %v1233_v8 = vld [vmem:[#allocation2 + $0x40] sm:$0xff]   ;;  %v1235_v10 = vld [vmem:[#allocation2 + $0x48] sm:$0xff]   ;;  %v1237_v13 = vld [vmem:[#allocation2 + $0x50] sm:$0xff]  }
  0x2a   :  { %v1234_v9 = vld [vmem:[#allocation2] sm:$0xff]   ;;  %1008 = vmatprep.subr.bf16.mxu1 %v1233_v8  ;;  %v1236_v12 = vld [vmem:[#allocation2 + $0x8] sm:$0xff]   ;;  %v52_v14 = vld [vmem:[%s1461_s0 + $0x18] sm:$0xff]  ;;  %v69_v38 = vsub.s32 0, %v68_v37  ;;  %v73_v40 = vsub.s32 1, %v68_v37 }
  0x2b   :  { %1009 = vmatpush3.bf16.msra.mxu1 %v1234_v9  ;;  %v1238_v15 = vld [vmem:[#allocation2 + $0x10] sm:$0xff]   ;;  %v58_v16 = vpack.c.bf16 %v52_v14, %v51_v11  ;;  %v1239_v17 = vld [vmem:[#allocation2 + $0x58] sm:$0xff]   ;;  %v1241_v19 = vld [vmem:[#allocation2 + $0x60] sm:$0xff]  }
  0x2c   :  { %113 = vmatpush1.bf16.msra.mxu0 %v1232_v4  ;;  %1010 = vmatprep.subr.bf16.mxu1 %v1235_v10  ;;  %v1240_v18 = vld [vmem:[#allocation2 + $0x18] sm:$0xff]   ;;  %v53_v20 = vld [vmem:[%s1461_s0 + $0x20] sm:$0xff]  ;;  %v54_v21 = vld [vmem:[%s1461_s0 + $0x28] sm:$0xff] }
  0x2d   :  { %v1242_v22 = vld [vmem:[#allocation2 + $0x20] sm:$0xff]   ;;  %v59_v23 = vpack.c.bf16 %v54_v21, %v53_v20  ;;  %v55_v24 = vld [vmem:[%s1461_s0 + $0x30] sm:$0xff]  ;;  %v56_v25 = vld [vmem:[%s1461_s0 + $0x38] sm:$0xff] }
  0x2e   :  { %v60_v26 = vpack.c.bf16 %v56_v25, %v55_v24  ;;  %v1243_v27 = vld [vmem:[#allocation2 + $0x68] sm:$0xff]   ;;  %v1245_v29 = vld [vmem:[#allocation2 + $0x70] sm:$0xff]   ;;  %v1247_v31 = vld [vmem:[#allocation2 + $0x78] sm:$0xff]  }
  0x2f   :  { %929 = vmatmul.mubr.msk.bf16.vlgmr.msra.gmra.mrb[0].mxu0 %vm97_vm0, %v57_v7  ;;  %1011 = vmatpush3.bf16.msra.mxu1 %v1236_v12  ;;  %v1244_v28 = vld [vmem:[#allocation2 + $0x28] sm:$0xff]   ;;  %v1246_v30 = vld [vmem:[#allocation2 + $0x30] sm:$0xff]   ;;  %v1248_v32 = vld [vmem:[#allocation2 + $0x38] sm:$0xff]  }
  0x30   :  { %152 = vmatprep.mubr.bf16.mxu0 %v1319_v0  ;;  %1012 = vmatprep.subr.bf16.mxu1 %v1237_v13  ;;  %v1249_v33 = vld [vmem:[#allocation2 + $0x80] sm:$0xff]   ;;  %v1250_v34 = vld [vmem:[#allocation2 + $0x88] sm:$0xff]   ;;  %v1251_v35 = vld [vmem:[#allocation2 + $0x90] sm:$0xff]  }
  0x31   :  { %1096 = vmatprep.subr.bf16.mxu0 %v1249_v33  ;;  %v65_v39 = vld [vmem:[%s1465_s4] sm:$0x3] }
  0x32   :  { %1097 = vmatpush3.bf16.msra.mxu0 %v1249_v33  ;;  %v1417_v41 = vrot.slane %v65_v39, %v69_v38  ;;  %v1419_v42 = vrot.slane %v65_v39, %v73_v40 }
  0x33   :  { %1013 = vmatpush3.bf16.msra.mxu1 %v1238_v15  ;;  %1098 = vmatprep.subr.bf16.mxu0 %v1250_v34 }
  0x34   :  { %1014 = vmatprep.subr.bf16.mxu1 %v1239_v17 }
  0x36   :  { %1099 = vmatpush3.bf16.msra.mxu0 %v1250_v34 }
  0x37   :  { %930 = vmatmul.mubr.msk.bf16.gmra.mrb[4].mxu0 %vm97_vm0, %v58_v16  ;;  %1015 = vmatpush3.bf16.msra.mxu1 %v1240_v18 }
  0x38   :  { %162 = vmatprep.mubr.bf16.mxu0 %v1319_v0  ;;  %1016 = vmatprep.subr.bf16.mxu1 %v1241_v19 }
  0x39   :  { %1100 = vmatprep.subr.bf16.mxu0 %v1251_v35 }
  0x3a   :  { %1101 = vmatpush3.bf16.msra.mxu0 %v1251_v35 }
  0x3b   :  { %1017 = vmatpush3.bf16.msra.mxu1 %v1242_v22 }
  0x3c   :  { %1018 = vmatprep.subr.bf16.mxu1 %v1243_v27 }
  0x3f   :  { %931 = vmatmul.mubr.msk.bf16.gmra.mrb[8].mxu0 %vm97_vm0, %v59_v23  ;;  %1019 = vmatpush3.bf16.msra.mxu1 %v1244_v28 }
  0x40   :  { %172 = vmatprep.mubr.bf16.mxu0 %v1319_v0  ;;  %1020 = vmatprep.subr.bf16.mxu1 %v1245_v29 }
  0x43   :  { %1021 = vmatpush3.bf16.msra.mxu1 %v1246_v30 }
  0x44   :  { %1022 = vmatprep.subr.bf16.mxu1 %v1247_v31 }
  0x47   :  { %932 = vmatmul.mubr.msk.bf16.gmra.mrb[12].mxu0 %vm97_vm0, %v60_v26  ;;  %1023 = vmatpush3.bf16.msra.mxu1 %v1248_v32 }
 0x102   :  { %v144_v43 = vpop.f32.mrb[0].mxu0 }
 0x103   :  { %v145_v44 = vadd.f32 %v144_v43, %v1417_v41  ;;  %v146_v45 = vpop.f32.mrb[1].mxu0 }
 0x104   :  { %v147_v46 = vadd.f32 %v146_v45, %v1419_v42  ;;  %v148_v47 = vpop.f32.mrb[2].mxu0 }
 0x105   :  { %v183_v48 = vmul.f32 0.01, %v145_v44  ;;  %v149_v49 = vadd.f32 %v148_v47, %v1417_v41  ;;  %v150_v50 = vpop.f32.mrb[3].mxu0 }
 0x106   :  { %v184_v51 = vmul.f32 0.01, %v147_v46  ;;  %v151_v52 = vadd.f32 %v150_v50, %v1419_v42 }
 0x107   :  { %v185_v53 = vmul.f32 0.01, %v149_v49  ;;  %v199_v55 = vmax.f32 %v145_v44, %v183_v48 }
 0x108   :  { %v186_v54 = vmul.f32 0.01, %v151_v52  ;;  %v200_v58 = vmax.f32 %v147_v46, %v184_v51 }
 0x109   :  { %v201_v56 = vmax.f32 %v149_v49, %v185_v53  ;;  %v1252_v53 = vld [vmem:[#allocation2 + $0x98] sm:$0xff]  }
 0x10a   :  { %v154_v57 = vpop.f32.mrb[4].mxu0  ;;  %v202_v59 = vmax.f32 %v151_v52, %v186_v54  ;;  %1102 = vmatprep.subr.bf16.mxu0 %v1252_v53  ;;  %v1254_v54 = vld [vmem:[#allocation2 + $0xa8] sm:$0xff]  }
 0x10b   :  { %v155_v60 = vadd.f32 %v154_v57, %v1417_v41  ;;  %v156_v61 = vpop.f32.mrb[5].mxu0  ;;  %v215_v62 = vpack.c.bf16 %v201_v56, %v199_v55  ;;  %1103 = vmatpush3.bf16.msra.mxu0 %v1252_v53  ;;  %v1256_v55 = vld [vmem:[#allocation2 + $0xb8] sm:$0xff]   ;;  %v1257_v56 = vld [vmem:[#allocation2 + $0xc0] sm:$0xff]   ;;  %v1258_v57 = vld [vmem:[#allocation2 + $0xc8] sm:$0xff]  }
 0x10c   :  { %v157_v63 = vadd.f32 %v156_v61, %v1419_v42  ;;  %v158_v0 = vpop.f32.mrb[6].mxu0  ;;  %v216_v1 = vpack.c.bf16 %v202_v59, %v200_v58  ;;  %1120 = vmatprep.subr.bf16.mxu1 %v1257_v56  ;;  %v1259_v58 = vld [vmem:[#allocation2 + $0xd0] sm:$0xff]   ;;  %v1260_v59 = vld [vmem:[#allocation2 + $0xd8] sm:$0xff]  }
 0x10d   :  { %v187_v2 = vmul.f32 0.01, %v155_v60  ;;  %v159_v3 = vadd.f32 %v158_v0, %v1417_v41  ;;  %v160_v4 = vpop.f32.mrb[7].mxu0  ;;  %v1263_v53 = vld [vmem:[#allocation2 + $0xf0] sm:$0xff]  }
 0x10e   :  { %v188_v5 = vmul.f32 0.01, %v157_v63  ;;  %v161_v6 = vadd.f32 %v160_v4, %v1419_v42  ;;  %390 = vmatprep.mubr.bf16.mxu1 %v216_v1 }
 0x10f   :  { %v189_v7 = vmul.f32 0.01, %v159_v3  ;;  %391 = vmatmul.mubr.bf16.vlgmr.msra.gmra.mrb[0].mxu1 %v215_v62  ;;  %v203_v9 = vmax.f32 %v155_v60, %v187_v2  ;;  %v1261_v60 = vld [vmem:[#allocation2 + $0xe0] sm:$0xff]  }
 0x110   :  { %v190_v8 = vmul.f32 0.01, %v161_v6  ;;  %v204_v11 = vmax.f32 %v157_v63, %v188_v5  ;;  %1121 = vmatpush3.bf16.msra.mxu1 %v1257_v56  ;;  %v933_v62 = vld [vmem:[%s1465_s4 + $0x2] ss:$0 sm:$0xff] }
 0x111   :  { %v205_v10 = vmax.f32 %v159_v3, %v189_v7  ;;  %1122 = vmatprep.subr.bf16.mxu1 %v1258_v57 }
 0x112   :  { %v206_v12 = vmax.f32 %v161_v6, %v190_v8  ;;  %v164_v13 = vpop.f32.mrb[8].mxu0 }
 0x113   :  { %v165_v14 = vadd.f32 %v164_v13, %v1417_v41  ;;  %v166_v15 = vpop.f32.mrb[9].mxu0  ;;  %v217_v16 = vpack.c.bf16 %v205_v10, %v203_v9 }
 0x114   :  { %v167_v17 = vadd.f32 %v166_v15, %v1419_v42  ;;  %v168_v18 = vpop.f32.mrb[10].mxu0  ;;  %v218_v19 = vpack.c.bf16 %v206_v12, %v204_v11  ;;  %1123 = vmatpush3.bf16.msra.mxu1 %v1258_v57  ;;  %v754_v57 = vld [vmem:[#allocation4 + $0x18] sm:$0xff] }
 0x115   :  { %v191_v20 = vmul.f32 0.01, %v165_v14  ;;  %v169_v21 = vadd.f32 %v168_v18, %v1417_v41  ;;  %v170_v22 = vpop.f32.mrb[11].mxu0  ;;  %1124 = vmatprep.subr.bf16.mxu1 %v1259_v58 }
 0x116   :  { %v192_v23 = vmul.f32 0.01, %v167_v17  ;;  %v171_v24 = vadd.f32 %v170_v22, %v1419_v42  ;;  %398 = vmatprep.mubr.bf16.mxu1 %v218_v19 }
 0x117   :  { %v193_v25 = vmul.f32 0.01, %v169_v21  ;;  %399 = vmatmul.mubr.bf16.gmra.mrb[4].mxu1 %v217_v16  ;;  %v207_v27 = vmax.f32 %v165_v14, %v191_v20 }
 0x118   :  { %v194_v26 = vmul.f32 0.01, %v171_v24  ;;  %v208_v29 = vmax.f32 %v167_v17, %v192_v23  ;;  %1125 = vmatpush3.bf16.msra.mxu1 %v1259_v58 }
 0x119   :  { %v209_v28 = vmax.f32 %v169_v21, %v193_v25  ;;  %1126 = vmatprep.subr.bf16.mxu1 %v1260_v59 }
 0x11a   :  { %v210_v30 = vmax.f32 %v171_v24, %v194_v26  ;;  %v174_v31 = vpop.f32.mrb[12].mxu0 }
 0x11b   :  { %v175_v32 = vadd.f32 %v174_v31, %v1417_v41  ;;  %v176_v33 = vpop.f32.mrb[13].mxu0  ;;  %v219_v34 = vpack.c.bf16 %v209_v28, %v207_v27 }
 0x11c   :  { %v177_v35 = vadd.f32 %v176_v33, %v1419_v42  ;;  %v178_v36 = vpop.f32.mrb[14].mxu0  ;;  %v220_v37 = vpack.c.bf16 %v210_v30, %v208_v29  ;;  %1127 = vmatpush3.bf16.msra.mxu1 %v1260_v59  ;;  %v755_v59 = vld [vmem:[#allocation4 + $0x20] sm:$0xff] }
 0x11d   :  { %v195_v38 = vmul.f32 0.01, %v175_v32  ;;  %v179_v39 = vadd.f32 %v178_v36, %v1417_v41  ;;  %v180_v40 = vpop.f32.mrb[15].mxu0  ;;  %v1253_v41 = vld [vmem:[#allocation2 + $0xa0] sm:$0xff]   ;;  %1128 = vmatprep.subr.bf16.mxu1 %v1261_v60 }
 0x11e   :  { %v196_v43 = vmul.f32 0.01, %v177_v35  ;;  %v181_v44 = vadd.f32 %v180_v40, %v1419_v42  ;;  %406 = vmatprep.mubr.bf16.mxu1 %v220_v37  ;;  %1104 = vmatprep.subr.bf16.mxu0 %v1253_v41  ;;  %v1255_v42 = vld [vmem:[#allocation2 + $0xb0] sm:$0xff]  }
 0x11f   :  { %v197_v45 = vmul.f32 0.01, %v179_v39  ;;  %407 = vmatmul.mubr.bf16.gmra.mrb[8].mxu1 %v219_v34  ;;  %v211_v47 = vmax.f32 %v175_v32, %v195_v38  ;;  %1105 = vmatpush3.bf16.msra.mxu0 %v1253_v41  ;;  %v1264_v41 = vld [vmem:[#allocation2 + $0xf8] sm:$0xff]  }
 0x120   :  { %v198_v46 = vmul.f32 0.01, %v181_v44  ;;  %v212_v49 = vmax.f32 %v177_v35, %v196_v43  ;;  %1106 = vmatprep.subr.bf16.mxu0 %v1254_v54  ;;  %1129 = vmatpush3.bf16.msra.mxu1 %v1261_v60  ;;  %v756_v60 = vld [vmem:[#allocation4 + $0x28] sm:$0xff] }
 0x121   :  { %v213_v48 = vmax.f32 %v179_v39, %v197_v45 }
 0x122   :  { %v214_v50 = vmax.f32 %v181_v44, %v198_v46 }
 0x123   :  { %v221_v51 = vpack.c.bf16 %v213_v48, %v211_v47  ;;  %1107 = vmatpush3.bf16.msra.mxu0 %v1254_v54  ;;  %v751_v54 = vld [vmem:[#allocation4] sm:$0xff] }
 0x124   :  { %v222_v52 = vpack.c.bf16 %v214_v50, %v212_v49  ;;  %1108 = vmatprep.subr.bf16.mxu0 %v1255_v42 }
 0x126   :  { %414 = vmatprep.mubr.bf16.mxu1 %v222_v52  ;;  %v1262_v52 = vld [vmem:[#allocation2 + $0xe8] sm:$0xff]  }
 0x127   :  { %415 = vmatmul.mubr.bf16.gmra.mrb[12].mxu1 %v221_v51  ;;  %1109 = vmatpush3.bf16.msra.mxu0 %v1255_v42  ;;  %v752_v42 = vld [vmem:[#allocation4 + $0x8] sm:$0xff] }
 0x128   :  { %1110 = vmatprep.subr.bf16.mxu0 %v1256_v55  ;;  %1130 = vmatprep.subr.bf16.mxu1 %v1262_v52  ;;  %v1188_v56 = vpack.c.bf16 %v752_v42, %v751_v54 }
 0x129   :  { %1131 = vmatpush3.bf16.msra.mxu1 %v1262_v52  ;;  %v959_v52 = vld [vmem:[%s1465_s4 + $0x4] ss:$0 sm:$0xff] }
 0x12a   :  { %1132 = vmatprep.subr.bf16.mxu1 %v1263_v53 }
 0x12b   :  { %1111 = vmatpush3.bf16.msra.mxu0 %v1256_v55  ;;  %v753_v55 = vld [vmem:[#allocation4 + $0x10] sm:$0xff] }
 0x12c   :  { %v1192_v58 = vpack.c.bf16 %v754_v57, %v753_v55  ;;  %1189 = vmatprep.subr.bf16.mxu0 %v1188_v56 }
 0x12d   :  { %1133 = vmatpush3.bf16.msra.mxu1 %v1263_v53 }
 0x12e   :  { %1134 = vmatprep.subr.bf16.mxu1 %v1264_v41 }
 0x131   :  { %1135 = vmatpush3.bf16.msra.mxu1 %v1264_v41 }
 0x1e2   :  { %v1024_v61 = vpop.f32.mrb[0].mxu1 }
 0x1e3   :  { %v1025_v63 = vpop.f32.mrb[1].mxu1 }
 0x1e4   :  { %v1026_v0 = vadd.f32 %v1025_v63, %v1024_v61  ;;  %v1027_v1 = vpop.f32.mrb[2].mxu1  ;;  %v1196_v61 = vpack.c.bf16 %v756_v60, %v755_v59  ;;  %v758_v63 = vld [vmem:[#allocation4 + $0x38] sm:$0xff] }
 0x1e5   :  { %v1028_v2 = vpop.f32.mrb[3].mxu1 }
 0x1e6   :  { %v393_v3 = vadd.f32 %v1026_v0, %v933_v62  ;;  %v1029_v4 = vadd.f32 %v1028_v2, %v1027_v1  ;;  %v759_v1 = vld [vmem:[#allocation4 + $0x40] sm:$0xff]  ;;  %v760_v2 = vld [vmem:[#allocation4 + $0x48] sm:$0xff] }
 0x1e8   :  { %v423_v5 = vmul.f32 0.01, %v393_v3  ;;  %v396_v6 = vadd.f32 %v1029_v4, %v933_v62  ;;  %v761_v4 = vld [vmem:[#allocation4 + $0x50] sm:$0xff] }
 0x1ea   :  { %v424_v7 = vmul.f32 0.01, %v396_v6  ;;  %v1030_v8 = vpop.f32.mrb[4].mxu1  ;;  %v431_v10 = vmax.f32 %v393_v3, %v423_v5  ;;  %v1204_v3 = vpack.c.bf16 %v760_v2, %v759_v1  ;;  %v762_v5 = vld [vmem:[#allocation4 + $0x58] sm:$0xff] }
 0x1eb   :  { %v1031_v9 = vpop.f32.mrb[5].mxu1 }
 0x1ec   :  { %v432_v11 = vmax.f32 %v396_v6, %v424_v7  ;;  %v1032_v12 = vadd.f32 %v1031_v9, %v1030_v8  ;;  %v1033_v13 = vpop.f32.mrb[6].mxu1  ;;  %v1208_v6 = vpack.c.bf16 %v762_v5, %v761_v4  ;;  %v950_v7 = vld [vmem:[%s1465_s4 + $0x3] ss:$0 sm:$0xff] }
 0x1ed   :  { %v1034_v14 = vpop.f32.mrb[7].mxu1 }
 0x1ee   :  { %v401_v15 = vadd.f32 %v1032_v12, %v933_v62  ;;  %v1035_v16 = vadd.f32 %v1034_v14, %v1033_v13  ;;  %v439_v17 = vpack.c.bf16 %v432_v11, %v431_v10 }
 0x1f0   :  { %v425_v18 = vmul.f32 0.01, %v401_v15  ;;  %v404_v19 = vadd.f32 %v1035_v16, %v933_v62  ;;  %1112 = vmatprep.mubr.bf16.mxu0 %v439_v17 }
 0x1f2   :  { %v426_v20 = vmul.f32 0.01, %v404_v19  ;;  %v1036_v21 = vpop.f32.mrb[8].mxu1  ;;  %v433_v23 = vmax.f32 %v401_v15, %v425_v18 }
 0x1f3   :  { %v1037_v22 = vpop.f32.mrb[9].mxu1 }
 0x1f4   :  { %v434_v24 = vmax.f32 %v404_v19, %v426_v20  ;;  %v1038_v25 = vadd.f32 %v1037_v22, %v1036_v21  ;;  %v1039_v26 = vpop.f32.mrb[10].mxu1 }
 0x1f5   :  { %v1040_v27 = vpop.f32.mrb[11].mxu1 }
 0x1f6   :  { %v440_v28 = vpack.c.bf16 %v434_v24, %v433_v23  ;;  %v409_v29 = vadd.f32 %v1038_v25, %v933_v62  ;;  %v1041_v30 = vadd.f32 %v1040_v27, %v1039_v26 }
 0x1f8   :  { %v427_v31 = vmul.f32 0.01, %v409_v29  ;;  %v412_v32 = vadd.f32 %v1041_v30, %v933_v62  ;;  %1113 = vmatmul.mubr.bf16.vlgmr.msra.gmra.mrb[16].mxu0 %v440_v28 }
 0x1f9   :  { %1191 = vmatpush3.bf16.msra.mxu0 %v1188_v56 }
 0x1fa   :  { %v428_v33 = vmul.f32 0.01, %v412_v32  ;;  %v1042_v34 = vpop.f32.mrb[12].mxu1  ;;  %v435_v36 = vmax.f32 %v409_v29, %v427_v31  ;;  %1193 = vmatprep.subr.bf16.mxu0 %v1192_v58 }
 0x1fb   :  { %v1043_v35 = vpop.f32.mrb[13].mxu1 }
 0x1fc   :  { %v436_v37 = vmax.f32 %v412_v32, %v428_v33  ;;  %v1044_v38 = vadd.f32 %v1043_v35, %v1042_v34  ;;  %v1045_v39 = vpop.f32.mrb[14].mxu1 }
 0x1fd   :  { %v1046_v40 = vpop.f32.mrb[15].mxu1  ;;  %1195 = vmatpush3.bf16.msra.mxu0 %v1192_v58 }
 0x1fe   :  { %v417_v43 = vadd.f32 %v1044_v38, %v933_v62  ;;  %v1047_v44 = vadd.f32 %v1046_v40, %v1045_v39  ;;  %v441_v45 = vpack.c.bf16 %v436_v37, %v435_v36  ;;  %1197 = vmatprep.subr.bf16.mxu0 %v1196_v61 }
 0x200   :  { %v429_v46 = vmul.f32 0.01, %v417_v43  ;;  %v420_v47 = vadd.f32 %v1047_v44, %v933_v62  ;;  %1116 = vmatprep.mubr.bf16.mxu0 %v441_v45  ;;  %v757_v62 = vld [vmem:[#allocation4 + $0x30] sm:$0xff] }
 0x201   :  { %v1200_v0 = vpack.c.bf16 %v758_v63, %v757_v62  ;;  %1199 = vmatpush3.bf16.msra.mxu0 %v1196_v61 }
 0x202   :  { %v430_v48 = vmul.f32 0.01, %v420_v47  ;;  %v437_v49 = vmax.f32 %v417_v43, %v429_v46  ;;  %v763_v46 = vld [vmem:[#allocation4 + $0x60] sm:$0xff] }
 0x203   :  { %1201 = vmatprep.subr.bf16.mxu0 %v1200_v0 }
 0x204   :  { %v438_v50 = vmax.f32 %v420_v47, %v430_v48  ;;  %v764_v47 = vld [vmem:[#allocation4 + $0x68] sm:$0xff] }
 0x205   :  { %1203 = vmatpush3.bf16.msra.mxu0 %v1200_v0  ;;  %v1212_v48 = vpack.c.bf16 %v764_v47, %v763_v46 }
 0x206   :  { %v442_v51 = vpack.c.bf16 %v438_v50, %v437_v49  ;;  %1205 = vmatprep.subr.bf16.mxu0 %v1204_v3  ;;  %v765_v49 = vld [vmem:[#allocation4 + $0x70] sm:$0xff]  ;;  %v766_v50 = vld [vmem:[#allocation4 + $0x78] sm:$0xff] }
 0x208   :  { %1117 = vmatmul.mubr.bf16.gmra.mrb[20].mxu0 %v442_v51  ;;  %v1216_v51 = vpack.c.bf16 %v766_v50, %v765_v49 }
 0x209   :  { %1207 = vmatpush3.bf16.msra.mxu0 %v1204_v3 }
 0x20a   :  { %1209 = vmatprep.subr.bf16.mxu0 %v1208_v6 }
 0x20d   :  { %1211 = vmatpush3.bf16.msra.mxu0 %v1208_v6 }
 0x20e   :  { %1213 = vmatprep.subr.bf16.mxu0 %v1212_v48 }
 0x211   :  { %1215 = vmatpush3.bf16.msra.mxu0 %v1212_v48 }
 0x212   :  { %1217 = vmatprep.subr.bf16.mxu0 %v1216_v51 }
 0x215   :  { %1219 = vmatpush3.bf16.msra.mxu0 %v1216_v51 }
 0x2cb   :  { %v1114_v8 = vpop.f32.mrb[16].mxu0 }
 0x2cc   :  { %v557_v9 = vadd.f32 %v1114_v8, %v950_v7  ;;  %v548_v10 = vpop.f32.mrb[17].mxu0 }
 0x2cd   :  { %v549_v11 = vadd.f32 %v950_v7, %v548_v10  ;;  %v1115_v12 = vpop.f32.mrb[18].mxu0 }
 0x2ce   :  { %v581_v13 = vmul.f32 0.01, %v557_v9  ;;  %v560_v14 = vadd.f32 %v1115_v12, %v950_v7  ;;  %v551_v15 = vpop.f32.mrb[19].mxu0 }
 0x2cf   :  { %v579_v16 = vmul.f32 0.01, %v549_v11  ;;  %v552_v17 = vadd.f32 %v950_v7, %v551_v15 }
 0x2d0   :  { %v582_v18 = vmul.f32 0.01, %v560_v14  ;;  %v589_v20 = vmax.f32 %v557_v9, %v581_v13 }
 0x2d1   :  { %v580_v19 = vmul.f32 0.01, %v552_v17  ;;  %v587_v22 = vmax.f32 %v549_v11, %v579_v16 }
 0x2d2   :  { %v590_v21 = vmax.f32 %v560_v14, %v582_v18 }
 0x2d3   :  { %v588_v23 = vmax.f32 %v552_v17, %v580_v19  ;;  %v968_v19 = vld [vmem:[%s1465_s4 + $0x5] ss:$0 sm:$0xff] }
 0x2d4   :  { %v596_v24 = vpack.c.bf16 %v590_v21, %v589_v20 }
 0x2d5   :  { %v595_v25 = vpack.c.bf16 %v588_v23, %v587_v22 }
 0x2d7   :  { %1136 = vmatprep.mubr.bf16.mxu1 %v595_v25 }
 0x2d8   :  { %1137 = vmatmul.mubr.bf16.vlgmr.msra.gmra.mrb[16].mxu1 %v596_v24 }
 0x2db   :  { %v1118_v26 = vpop.f32.mrb[20].mxu0 }
 0x2dc   :  { %v573_v27 = vadd.f32 %v1118_v26, %v950_v7  ;;  %v564_v28 = vpop.f32.mrb[21].mxu0 }
 0x2dd   :  { %v565_v29 = vadd.f32 %v950_v7, %v564_v28  ;;  %v1119_v30 = vpop.f32.mrb[22].mxu0 }
 0x2de   :  { %v585_v31 = vmul.f32 0.01, %v573_v27  ;;  %v576_v32 = vadd.f32 %v1119_v30, %v950_v7  ;;  %v567_v33 = vpop.f32.mrb[23].mxu0 }
 0x2df   :  { %v583_v34 = vmul.f32 0.01, %v565_v29  ;;  %v568_v35 = vadd.f32 %v950_v7, %v567_v33 }
 0x2e0   :  { %v586_v36 = vmul.f32 0.01, %v576_v32  ;;  %v593_v38 = vmax.f32 %v573_v27, %v585_v31 }
 0x2e1   :  { %v584_v37 = vmul.f32 0.01, %v568_v35  ;;  %v591_v40 = vmax.f32 %v565_v29, %v583_v34 }
 0x2e2   :  { %v594_v39 = vmax.f32 %v576_v32, %v586_v36 }
 0x2e3   :  { %v592_v43 = vmax.f32 %v568_v35, %v584_v37 }
 0x2e4   :  { %v598_v44 = vpack.c.bf16 %v594_v39, %v593_v38 }
 0x2e5   :  { %v597_v45 = vpack.c.bf16 %v592_v43, %v591_v40 }
 0x2e7   :  { %1140 = vmatprep.mubr.bf16.mxu1 %v597_v45 }
 0x2e8   :  { %1141 = vmatmul.mubr.bf16.gmra.mrb[20].mxu1 %v598_v44 }
 0x3ab   :  { %v1138_v53 = vpop.f32.mrb[16].mxu1 }
 0x3ac   :  { %v713_v41 = vadd.f32 %v1138_v53, %v959_v52  ;;  %v704_v54 = vpop.f32.mrb[17].mxu1 }
 0x3ad   :  { %v705_v42 = vadd.f32 %v959_v52, %v704_v54  ;;  %v1139_v55 = vpop.f32.mrb[18].mxu1 }
 0x3ae   :  { %v707_v56 = vpop.f32.mrb[19].mxu1  ;;  %v716_v58 = vadd.f32 %v1139_v55, %v959_v52  ;;  %v737_v60 = vmul.f32 0.01, %v713_v41 }
 0x3af   :  { %v735_v57 = vmul.f32 0.01, %v705_v42  ;;  %v708_v59 = vadd.f32 %v959_v52, %v707_v56 }
 0x3b0   :  { %v738_v63 = vmul.f32 0.01, %v716_v58  ;;  %v745_v1 = vmax.f32 %v713_v41, %v737_v60 }
 0x3b1   :  { %v743_v61 = vmax.f32 %v705_v42, %v735_v57  ;;  %v736_v62 = vmul.f32 0.01, %v708_v59 }
 0x3b2   :  { %v746_v2 = vmax.f32 %v716_v58, %v738_v63 }
 0x3b3   :  { %v744_v0 = vmax.f32 %v708_v59, %v736_v62  ;;  %1176 = vmatprep.mubr.f32.mxu0 %v743_v61 }
 0x3b5   :  { %1177 = vmatmul.mubr.f32.vlgmr.msra.gmra.mrb[24].mxu0 %v744_v0 }
 0x3b6   :  { %1179 = vmatprep.mubr.f32.mxu0 %v745_v1 }
 0x3b9   :  { %1180 = vmatmul.mubr.f32.gmra.mrb[26].mxu0 %v746_v2 }
 0x3bb   :  { %v1142_v3 = vpop.f32.mrb[20].mxu1 }
 0x3bc   :  { %v729_v4 = vadd.f32 %v1142_v3, %v959_v52  ;;  %v720_v5 = vpop.f32.mrb[21].mxu1 }
 0x3bd   :  { %v721_v6 = vadd.f32 %v959_v52, %v720_v5  ;;  %v1143_v7 = vpop.f32.mrb[22].mxu1 }
 0x3be   :  { %v723_v8 = vpop.f32.mrb[23].mxu1  ;;  %v732_v10 = vadd.f32 %v1143_v7, %v959_v52  ;;  %v741_v12 = vmul.f32 0.01, %v729_v4 }
 0x3bf   :  { %v739_v9 = vmul.f32 0.01, %v721_v6  ;;  %v724_v11 = vadd.f32 %v959_v52, %v723_v8 }
 0x3c0   :  { %v742_v15 = vmul.f32 0.01, %v732_v10  ;;  %v749_v17 = vmax.f32 %v729_v4, %v741_v12 }
 0x3c1   :  { %v747_v13 = vmax.f32 %v721_v6, %v739_v9  ;;  %v740_v14 = vmul.f32 0.01, %v724_v11 }
 0x3c2   :  { %v750_v18 = vmax.f32 %v732_v10, %v742_v15 }
 0x3c3   :  { %v748_v16 = vmax.f32 %v724_v11, %v740_v14  ;;  %1182 = vmatprep.mubr.f32.mxu0 %v747_v13 }
 0x3c5   :  { %1183 = vmatmul.mubr.f32.gmra.mrb[28].mxu0 %v748_v16 }
 0x3c6   :  { %1185 = vmatprep.mubr.f32.mxu0 %v749_v17 }
 0x3c9   :  { %1186 = vmatmul.mubr.f32.gmra.mrb[30].mxu0 %v750_v18 }
 0x488   :  { %v1178_v20 = vpop.f32.mrb[24].mxu0 }
 0x489   :  { %v846_v21 = vadd.f32 %v1178_v20, %v968_v19  ;;  %v840_v22 = vpop.f32.mrb[25].mxu0 }
 0x48a   :  { %v841_v23 = vadd.f32 %v968_v19, %v840_v22 }
 0x48c   :  { %v988_v24 = vpack.c.bf16 %v846_v21, %v841_v23  ;;  %v1181_v25 = vpop.f32.mrb[26].mxu0 }
 0x48d   :  { %v856_v26 = vadd.f32 %v1181_v25, %v968_v19  ;;  %v850_v27 = vpop.f32.mrb[27].mxu0 }
 0x48e   :  { %989 = vst [vmem:[%s1466_s5] sm:$0xff] %v988_v24   ;;  %v851_v28 = vadd.f32 %v968_v19, %v850_v27 }
 0x490   :  { %v993_v29 = vpack.c.bf16 %v856_v26, %v851_v28 }
 0x492   :  { %1005 = vst [vmem:[%s1466_s5 + $0x8] sm:$0xff] %v993_v29  }
 0x498   :  { %v1184_v30 = vpop.f32.mrb[28].mxu0 }
 0x499   :  { %v866_v31 = vadd.f32 %v1184_v30, %v968_v19  ;;  %v860_v32 = vpop.f32.mrb[29].mxu0 }
 0x49a   :  { %v861_v33 = vadd.f32 %v968_v19, %v860_v32 }
 0x49c   :  { %v998_v34 = vpack.c.bf16 %v866_v31, %v861_v33  ;;  %v1187_v35 = vpop.f32.mrb[30].mxu0 }
 0x49d   :  { %v876_v36 = vadd.f32 %v1187_v35, %v968_v19  ;;  %v870_v37 = vpop.f32.mrb[31].mxu0 }
 0x49e   :  { %1006 = vst [vmem:[%s1466_s5 + $0x10] sm:$0xff] %v998_v34   ;;  %v871_v38 = vadd.f32 %v968_v19, %v870_v37 }
 0x4a0   :  { %v1003_v39 = vpack.c.bf16 %v876_v36, %v871_v38 }
 0x4a2   :  { %1007 = vst [vmem:[%s1466_s5 + $0x18] sm:$0xff] %v1003_v39  }
 0x4a3   :  { %923 = vsyncpa [#allocation3], 1 }
 0x4a4   :  { %924 = vsyncpa [#allocation5], 1 }

</bundles_post_ra>
